<compile_context>
chip_gen: v6e
topology: v6e:2x2x1
jax: 0.10.0
libtpu: 0.0.40
codegen_flags: <defaults>
</compile_context>

<pallas_src>
import functools
import math

import jax
import jax.numpy as jnp
from jax import lax
from jax.experimental import pallas as pl
from jax.experimental.pallas import tpu as pltpu


# Explicit scoped-VMEM budget: < 64 MiB (v7x per-TC physical), well under
# 128 MiB on v5e/v6e. Actual per-step usage is far below this.
_VMEM_LIMIT = 48 * 1024 * 1024


def _pick_tile(dim, target, align):
    """Tile size that always yields a legal Mosaic block shape.

    Returns the full dim if it fits the target (full-dim blocks are always
    legal), else a multiple of `align` (8 for sublanes, 128 for lanes),
    preferring an exact divisor near the target so grids stay exact; otherwise
    pl.cdiv grids with a partial last block are used by the callers.
    """
    if dim <= target:
        return dim
    t = max(align, (target // align) * align)
    for cand in range(t, max(align, t // 2) - 1, -align):
        if dim % cand == 0:
            return cand
    return t


def _gelu(x):
    # tanh-approximate GELU (exp/tanh only -> safe Mosaic lowering).
    c = math.sqrt(2.0 / math.pi)
    return 0.5 * x * (1.0 + jnp.tanh(c * (x + 0.044715 * x * x * x)))


# ----------------------------------------------------------------------------
# Kernel 1: fused [LayerNorm ->] linear -> [GELU] -> [+ residual]
#   grid = (M/tm, Nout/tn); the x block spans the full K dim (tk == K), so the
#   LayerNorm of the source activation can be computed in the prologue and the
#   bf16 MXU dot accumulates in f32 with no revisit / accumulator scratch.
# ----------------------------------------------------------------------------
def _linear_kernel(x_ref, w_ref, b_ref, *rest, activation, has_residual,
                   has_ln, ln_eps):
    rest = list(rest)
    if has_ln:
        g_ref = rest.pop(0)
        bt_ref = rest.pop(0)
    if has_residual:
        r_ref = rest.pop(0)
    o_ref = rest.pop(0)

    if has_ln:
        x = x_ref[...].astype(jnp.float32)
        mean = jnp.mean(x, axis=-1, keepdims=True)
        xc = x - mean
        var = jnp.mean(xc * xc, axis=-1, keepdims=True)
        x = xc * lax.rsqrt(var + ln_eps)
        x = x * g_ref[...].astype(jnp.float32) + bt_ref[...].astype(jnp.float32)
        xm = x.astype(jnp.bfloat16)
    else:
        xm = x_ref[...].astype(jnp.bfloat16)

    y = jnp.dot(xm, w_ref[...].astype(jnp.bfloat16),
                preferred_element_type=jnp.float32)
    y = y + b_ref[...].astype(jnp.float32)
    if activation == "gelu":
        y = _gelu(y)
    if has_residual:
        y = y + r_ref[...].astype(jnp.float32)
    o_ref[...] = y.astype(o_ref.dtype)


def pallas_linear(x2d, w, b, *, ln=None, residual=None, activation=None,
                  out_dtype=None, tm=256, tn=512):
    """y = act(LN?(x2d) @ w + b) [+ residual].  x2d: (M, K), w: (K, Nout)."""
    M, K = x2d.shape
    Kw, Nout = w.shape
    assert K == Kw
    out_dtype = out_dtype if out_dtype is not None else x2d.dtype

    tm = _pick_tile(M, tm, 8)
    tn = _pick_tile(Nout, tn, 128)
    grid = (pl.cdiv(M, tm), pl.cdiv(Nout, tn))

    in_specs = [
        pl.BlockSpec((tm, K), lambda i, j: (i, 0)),   # full-K slab -> fused LN ok
        pl.BlockSpec((K, tn), lambda i, j: (0, j)),
        pl.BlockSpec((1, tn), lambda i, j: (0, j)),
    ]
    args = [x2d, w, b.reshape(1, Nout)]
    if ln is not None:
        gamma, beta = ln
        in_specs += [pl.BlockSpec((1, K), lambda i, j: (0, 0)),
                     pl.BlockSpec((1, K), lambda i, j: (0, 0))]
        args += [gamma.reshape(1, K), beta.reshape(1, K)]
    if residual is not None:
        in_specs.append(pl.BlockSpec((tm, tn), lambda i, j: (i, j)))
        args.append(residual)

    kernel = functools.partial(
        _linear_kernel, activation=activation,
        has_residual=residual is not None, has_ln=ln is not None, ln_eps=1e-5)

    return pl.pallas_call(
        kernel,
        grid=grid,
        in_specs=in_specs,
        out_specs=pl.BlockSpec((tm, tn), lambda i, j: (i, j)),
        out_shape=jax.ShapeDtypeStruct((M, Nout), out_dtype),
        compiler_params=pltpu.CompilerParams(
            dimension_semantics=("parallel", "parallel"),
            vmem_limit_bytes=_VMEM_LIMIT,
        ),
    )(*args)


# ----------------------------------------------------------------------------
# Kernel 2: multi-head attention core (reads q/k/v straight out of the fused
# (B, N, 3C) qkv buffer; writes merged-head (B, N, C) with one lane-dense
# store per grid step).
# ----------------------------------------------------------------------------
def _attend_one_head(q, k, v, scale):
    """q,k,v: (N, Dh) -> context (N, Dh) f32.  bf16 MXU dots, f32 accumulate."""
    qs = (q.astype(jnp.float32) * scale).astype(jnp.bfloat16)   # fold scale into q
    s = lax.dot_general(qs, k.astype(jnp.bfloat16),
                        (((1,), (1,)), ((), ())),
                        preferred_element_type=jnp.float32)      # (N, N), no k.T
    m = jnp.max(s, axis=-1, keepdims=True)
    p = jnp.exp(s - m)
    denom = jnp.sum(p, axis=-1, keepdims=True)
    o = jnp.dot(p.astype(jnp.bfloat16), v.astype(jnp.bfloat16),
                preferred_element_type=jnp.float32)              # (N, Dh)
    # Normalize after p@v ((N,Dh) work instead of (N,N)); EUP reciprocal.
    return o * pl.reciprocal(denom, approx=True)


def _attn_kernel_grouped(q_ref, k_ref, v_ref, o_ref, acc_ref, *, heads, scale):
    W = q_ref.shape[-1]
    Dh = W // heads
    q = q_ref[0]
    k = k_ref[0]
    v = v_ref[0]
    for h in range(heads):                 # static loop; scratch bounds live ranges
        sl = slice(h * Dh, (h + 1) * Dh)
        acc_ref[:, sl] = _attend_one_head(q[:, sl], k[:, sl], v[:, sl], scale)
    o_ref[0] = acc_ref[...].astype(o_ref.dtype)


def _attn_kernel_fused(qkv_ref, o_ref, acc_ref, *, num_heads, scale):
    qkv = qkv_ref[0].astype(jnp.float32)   # (N, 3C)
    C = qkv.shape[-1] // 3
    Dh = C // num_heads
    for h in range(num_heads):
        q = qkv[:, h * Dh:(h + 1) * Dh]
        k = qkv[:, C + h * Dh:C + (h + 1) * Dh]
        v = qkv[:, 2 * C + h * Dh:2 * C + (h + 1) * Dh]
        acc_ref[:, h * Dh:(h + 1) * Dh] = _attend_one_head(q, k, v, scale)
    o_ref[0] = acc_ref[...].astype(o_ref.dtype)


def pallas_attention(qkv, *, num_heads, scale, out_dtype=None):
    """qkv: (B, N, 3C) fused projection -> context (B, N, C), heads merged."""
    B, N, C3 = qkv.shape
    C = C3 // 3
    Dh = C // num_heads
    out_dtype = out_dtype if out_dtype is not None else qkv.dtype

    if C % 128 == 0:
        # Head-group path: 128-lane-aligned q/k/v slabs, (B, groups) parallel grid.
        hg = num_heads
        for d in range(1, num_heads + 1):
            if num_heads % d == 0 and (d * Dh) % 128 == 0:
                hg = d
                break
        gw = hg * Dh
        n_groups = C // gw
        kernel = functools.partial(_attn_kernel_grouped, heads=hg, scale=scale)
        return pl.pallas_call(
            kernel,
            grid=(B, n_groups),
            in_specs=[
                pl.BlockSpec((1, N, gw), lambda b, g: (b, 0, g)),                 # q
                pl.BlockSpec((1, N, gw), lambda b, g: (b, 0, n_groups + g)),      # k
                pl.BlockSpec((1, N, gw), lambda b, g: (b, 0, 2 * n_groups + g)),  # v
            ],
            out_specs=pl.BlockSpec((1, N, gw), lambda b, g: (b, 0, g)),
            out_shape=jax.ShapeDtypeStruct((B, N, C), out_dtype),
            scratch_shapes=[pltpu.VMEM((N, gw), jnp.float32)],
            compiler_params=pltpu.CompilerParams(
                dimension_semantics=("parallel", "parallel"),
                vmem_limit_bytes=_VMEM_LIMIT,
            ),
        )(qkv, qkv, qkv)

    # Fallback (C not a multiple of 128): whole fused (N, 3C) block per batch.
    kernel = functools.partial(_attn_kernel_fused, num_heads=num_heads, scale=scale)
    return pl.pallas_call(
        kernel,
        grid=(B,),
        in_specs=[pl.BlockSpec((1, N, C3), lambda b: (b, 0, 0))],
        out_specs=pl.BlockSpec((1, N, C), lambda b: (b, 0, 0)),
        out_shape=jax.ShapeDtypeStruct((B, N, C), out_dtype),
        scratch_shapes=[pltpu.VMEM((N, C), jnp.float32)],
        compiler_params=pltpu.CompilerParams(
            dimension_semantics=("parallel",),
            vmem_limit_bytes=_VMEM_LIMIT,
        ),
    )(qkv)


# ----------------------------------------------------------------------------
# Block: parameter init + forward (glue is pure reshapes; all compute in
# Pallas kernels).
# ----------------------------------------------------------------------------
def init_block_params(key, dim, num_heads, mlp_ratio=4.0, qkv_bias=False,
                      param_dtype=jnp.bfloat16):
    hidden = int(dim * mlp_ratio)
    ks = jax.random.split(key, 8)

    def w(k, fin, fout):  # stored transposed vs torch nn.Linear: (in, out), bf16
        return (jax.random.normal(k, (fin, fout), jnp.float32) * 0.02).astype(param_dtype)

    def bvec(k, n):
        return jax.random.normal(k, (n,), jnp.float32) * 0.02

    return {
        "num_heads": num_heads,
        "ln1_g": jnp.ones((dim,), jnp.float32), "ln1_b": jnp.zeros((dim,), jnp.float32),
        "ln2_g": jnp.ones((dim,), jnp.float32), "ln2_b": jnp.zeros((dim,), jnp.float32),
        "w_qkv": w(ks[0], dim, 3 * dim),
        "b_qkv": bvec(ks[1], 3 * dim) if qkv_bias else jnp.zeros((3 * dim,), jnp.float32),
        "w_proj": w(ks[2], dim, dim), "b_proj": bvec(ks[3], dim),
        "w_fc1": w(ks[4], dim, hidden), "b_fc1": bvec(ks[5], hidden),
        "w_fc2": w(ks[6], hidden, dim), "b_fc2": bvec(ks[7], dim),
    }


def block_forward(params, x):
    B, N, C = x.shape
    H = params["num_heads"]
    Dh = C // H
    scale = Dh ** (-0.5)
    M = B * N
    x2d = x.reshape(M, C).astype(jnp.float32)          # residual stream in f32

    # ---- x = x + proj(Attention(LayerNorm1(x))) ----
    qkv = pallas_linear(x2d, params["w_qkv"], params["b_qkv"],
                        ln=(params["ln1_g"], params["ln1_b"]),
                        out_dtype=jnp.bfloat16)                      # fused LN1 + qkv
    ctx = pallas_attention(qkv.reshape(B, N, 3 * C), num_heads=H, scale=scale,
                           out_dtype=jnp.bfloat16)                   # (B, N, C)
    x2d = pallas_linear(ctx.reshape(M, C), params["w_proj"], params["b_proj"],
                        residual=x2d, out_dtype=jnp.float32)         # proj + residual

    # ---- x = x + fc2(GELU(fc1(LayerNorm2(x)))) ----
    h = pallas_linear(x2d, params["w_fc1"], params["b_fc1"],
                      ln=(params["ln2_g"], params["ln2_b"]),
                      activation="gelu", out_dtype=jnp.bfloat16)     # fused LN2 + fc1 + GELU
    x2d = pallas_linear(h, params["w_fc2"], params["b_fc2"],
                        residual=x2d, out_dtype=jnp.float32)         # fc2 + residual

    return x2d.reshape(B, N, C).astype(x.dtype)


# ----------------------------------------------------------------------------
# Pure-JAX f32 reference for correctness check
# ----------------------------------------------------------------------------
def block_ref(params, x):
    f32 = lambda a: a.astype(jnp.float32)
    B, N, C = x.shape
    H = params["num_heads"]
    Dh = C // H
    scale = Dh ** (-0.5)

    def layernorm(y, g, b, eps=1e-5):
        mean = y.mean(-1, keepdims=True)
        var = ((y - mean) ** 2).mean(-1, keepdims=True)
        return (y - mean) * lax.rsqrt(var + eps) * g + b

    x = f32(x)
    xn = layernorm(x, params["ln1_g"], params["ln1_b"])
    qkv = xn @ f32(params["w_qkv"]) + params["b_qkv"]
    qkv = qkv.reshape(B, N, 3, H, Dh).transpose(2, 0, 3, 1, 4)
    q, k, v = qkv[0], qkv[1], qkv[2]
    attn = jnp.einsum("bhqd,bhkd->bhqk", q, k) * scale
    attn = jax.nn.softmax(attn, axis=-1)
    ctx = jnp.einsum("bhqk,bhkd->bhqd", attn, v).transpose(0, 2, 1, 3).reshape(B, N, C)
    x = x + (ctx @ f32(params["w_proj"]) + params["b_proj"])

    xn = layernorm(x, params["ln2_g"], params["ln2_b"])
    h = _gelu(xn @ f32(params["w_fc1"]) + params["b_fc1"])
    x = x + (h @ f32(params["w_fc2"]) + params["b_fc2"])
    return x


if __name__ == "__main__":
    def run_case(B, N, C, H, seed):
        key = jax.random.PRNGKey(seed)
        kx, kp = jax.random.split(key)
        x = jax.random.normal(kx, (B, N, C), jnp.float32)
        params = init_block_params(kp, dim=C, num_heads=H, mlp_ratio=4.0,
                                   qkv_bias=True)
        out = jax.block_until_ready(block_forward(params, x))
        ref = block_ref(params, x)
        assert out.shape == (B, N, C), out.shape
        err = float(jnp.max(jnp.abs(out - ref)))
        # bf16 mixed precision + approx reciprocal -> a few e-3 typical error
        assert jnp.allclose(out, ref, atol=3e-2, rtol=3e-2), err
        return err

    # Exercises the lane-aligned head-group attention path (C % 128 == 0).
    run_case(B=2, N=8, C=256, H=2, seed=0)
    # Exercises the fused-qkv fallback path (C not a multiple of 128).
    run_case(B=2, N=8, C=32, H=4, seed=1)
    print("KERNEL_OK")
</pallas_src>

<mosaic_0001>
module attributes {stable_mosaic.version = 11 : i64} {
  func.func @_linear_kernel(%arg0: i32, %arg1: i32, %arg2: memref<16x256xf32, #tpu.memory_space<vmem>>, %arg3: memref<256x384xbf16, #tpu.memory_space<vmem>>, %arg4: memref<1x384xf32, #tpu.memory_space<vmem>>, %arg5: memref<1x256xf32, #tpu.memory_space<vmem>>, %arg6: memref<1x256xf32, #tpu.memory_space<vmem>>, %arg7: memref<16x384xbf16, #tpu.memory_space<vmem>>) attributes {dimension_semantics = [#tpu.dimension_semantics<parallel>, #tpu.dimension_semantics<parallel>], iteration_bounds = array<i64: 1, 2>, scalar_prefetch = 0 : i64, scratch_operands = 0 : i64, tpu.core_type = #tpu.core_type<tc>, window_params = [{transform_indices = @transform_0, window_bounds = array<i64: 16, 256>}, {transform_indices = @transform_1, window_bounds = array<i64: 256, 384>}, {transform_indices = @transform_2, window_bounds = array<i64: 1, 384>}, {pipeline_mode = #tpu.pipeline_mode<synchronous>, transform_indices = @transform_3, window_bounds = array<i64: 1, 256>}, {pipeline_mode = #tpu.pipeline_mode<synchronous>, transform_indices = @transform_4, window_bounds = array<i64: 1, 256>}, {transform_indices = @transform_5, window_bounds = array<i64: 16, 384>}]} {
    %c0 = arith.constant 0 : index
    %c0_0 = arith.constant 0 : index
    %0 = vector.load %arg2[%c0, %c0_0] : memref<16x256xf32, #tpu.memory_space<vmem>>, vector<16x256xf32>
    %cst = arith.constant dense<0.000000e+00> : vector<16xf32>
    %1 = vector.multi_reduction <add>, %0, %cst [1] : vector<16x256xf32> to vector<16xf32>
    %2 = vector.shape_cast %1 : vector<16xf32> to vector<16x1xf32>
    %cst_1 = arith.constant 2.560000e+02 : f32
    %3 = vector.broadcast %cst_1 : f32 to vector<16x1xf32>
    %4 = arith.divf %2, %3 : vector<16x1xf32>
    %5 = vector.broadcast %4 : vector<16x1xf32> to vector<16x256xf32>
    %6 = arith.subf %0, %5 : vector<16x256xf32>
    %7 = arith.mulf %6, %6 : vector<16x256xf32>
    %cst_2 = arith.constant dense<0.000000e+00> : vector<16xf32>
    %8 = vector.multi_reduction <add>, %7, %cst_2 [1] : vector<16x256xf32> to vector<16xf32>
    %9 = vector.shape_cast %8 : vector<16xf32> to vector<16x1xf32>
    %cst_3 = arith.constant 2.560000e+02 : f32
    %10 = vector.broadcast %cst_3 : f32 to vector<16x1xf32>
    %11 = arith.divf %9, %10 : vector<16x1xf32>
    %cst_4 = arith.constant 9.99999974E-6 : f32
    %12 = vector.broadcast %cst_4 : f32 to vector<16x1xf32>
    %13 = arith.addf %11, %12 : vector<16x1xf32>
    %14 = math.rsqrt %13 : vector<16x1xf32>
    %15 = vector.broadcast %14 : vector<16x1xf32> to vector<16x256xf32>
    %16 = arith.mulf %6, %15 : vector<16x256xf32>
    %c0_5 = arith.constant 0 : index
    %c0_6 = arith.constant 0 : index
    %17 = vector.load %arg5[%c0_5, %c0_6] : memref<1x256xf32, #tpu.memory_space<vmem>>, vector<1x256xf32>
    %18 = vector.broadcast %17 : vector<1x256xf32> to vector<16x256xf32>
    %19 = arith.mulf %16, %18 : vector<16x256xf32>
    %c0_7 = arith.constant 0 : index
    %c0_8 = arith.constant 0 : index
    %20 = vector.load %arg6[%c0_7, %c0_8] : memref<1x256xf32, #tpu.memory_space<vmem>>, vector<1x256xf32>
    %21 = vector.broadcast %20 : vector<1x256xf32> to vector<16x256xf32>
    %22 = arith.addf %19, %21 : vector<16x256xf32>
    %23 = arith.truncf %22 : vector<16x256xf32> to vector<16x256xbf16>
    %c0_9 = arith.constant 0 : index
    %c0_10 = arith.constant 0 : index
    %24 = vector.load %arg3[%c0_9, %c0_10] : memref<256x384xbf16, #tpu.memory_space<vmem>>, vector<256x384xbf16>
    %cst_11 = arith.constant dense<0.000000e+00> : vector<16x384xf32>
    %25 = tpu.matmul %23, %24, %cst_11 {dimension_numbers = #tpu.dot_dimension_numbers<[1], [0], [0], [1], [0, 0, 1, 1], [], []>} : vector<16x256xbf16>, vector<256x384xbf16>, vector<16x384xf32> -> vector<16x384xf32>
    %c0_12 = arith.constant 0 : index
    %c0_13 = arith.constant 0 : index
    %26 = vector.load %arg4[%c0_12, %c0_13] : memref<1x384xf32, #tpu.memory_space<vmem>>, vector<1x384xf32>
    %27 = vector.broadcast %26 : vector<1x384xf32> to vector<16x384xf32>
    %28 = arith.addf %25, %27 : vector<16x384xf32>
    %29 = arith.truncf %28 : vector<16x384xf32> to vector<16x384xbf16>
    %c0_14 = arith.constant 0 : index
    %c0_15 = arith.constant 0 : index
    %30 = vector.load %arg7[%c0_14, %c0_15] : memref<16x384xbf16, #tpu.memory_space<vmem>>, vector<16x384xbf16>
    tpu.vector_store %arg7[%c0_14, %c0_15], %29 {strides = array<i32>} : memref<16x384xbf16, #tpu.memory_space<vmem>>, vector<16x384xbf16>,
    return
  }
  func.func @transform_0(%arg0: i32, %arg1: i32) -> (i32, i32) {
    %c0_i32 = arith.constant 0 : i32
    %c0_i32_0 = arith.constant 0 : i32
    return %arg0, %c0_i32 : i32, i32
  }
  func.func @transform_1(%arg0: i32, %arg1: i32) -> (i32, i32) {
    %c0_i32 = arith.constant 0 : i32
    %c0_i32_0 = arith.constant 0 : i32
    return %c0_i32, %arg1 : i32, i32
  }
  func.func @transform_2(%arg0: i32, %arg1: i32) -> (i32, i32) {
    %c0_i32 = arith.constant 0 : i32
    %c0_i32_0 = arith.constant 0 : i32
    return %c0_i32, %arg1 : i32, i32
  }
  func.func @transform_3(%arg0: i32, %arg1: i32) -> (i32, i32) {
    %c0_i32 = arith.constant 0 : i32
    %c0_i32_0 = arith.constant 0 : i32
    %c0_i32_1 = arith.constant 0 : i32
    return %c0_i32, %c0_i32_0 : i32, i32
  }
  func.func @transform_4(%arg0: i32, %arg1: i32) -> (i32, i32) {
    %c0_i32 = arith.constant 0 : i32
    %c0_i32_0 = arith.constant 0 : i32
    %c0_i32_1 = arith.constant 0 : i32
    return %c0_i32, %c0_i32_0 : i32, i32
  }
  func.func @transform_5(%arg0: i32, %arg1: i32) -> (i32, i32) {
    %c0_i32 = arith.constant 0 : i32
    return %arg0, %arg1 : i32, i32
  }
}

</mosaic_0001>

<bundles_post_ra>
// kernel: tpu_custom_call.1
= control target key start
LH: loop header
LB: loop body
LE: loop exit
PB: predicated region body
PF: predicated region fallthrough
CT: control target
= control target key end

     0   :  { %s1712_s0 = inlined_call_operand.hbm [shape: f32[16,256], index: 0, kind: input, shape index: {}]   ;;  %s1713_s1 = inlined_call_operand.hbm [shape: bf16[256,768], index: 1, kind: input, shape index: {}]   ;;  %s1714_s2 = inlined_call_operand.hbm [shape: f32[1,768], index: 2, kind: input, shape index: {}]   ;;  %s1715_s3 = inlined_call_operand.vmem [shape: f32[1,256], index: 3, kind: input, shape index: {}]   ;;  %s1716_s4 = inlined_call_operand.vmem [shape: f32[1,256], index: 4, kind: input, shape index: {}]   ;;  %s1717_s5 = inlined_call_operand.hbm [shape: bf16[16,768], index: 5, kind: output, shape index: {}]  }
   0x1   :  { %1721 = sst [smem:[#allocation12_spill]] %s1713_s1 }
   0x2   :  { %1722 = sst [smem:[#allocation13_spill]] %s1714_s2 }
   0x3   :  { %10 = vsyncpa [#allocation3], 0 }
   0x4   :  { %11 = vsyncpa [#allocation6], 0 }
   0x5   :  { %13 = vsyncpa [#allocation6 + $0x1], 0 }
   0x6   :  { %14 = vsyncpa [#allocation4], 0 }
   0x7   :  { %16 = vsyncpa [#allocation4 + $0x1], 0  ;;  %s1435_s18 = smov 0   ;;  %s1437_s19 = smov 0  }
   0x8   :  { %s1439_s20 = smov 0   ;;  %s1441_s21 = smov 0  }
   0x9   :  { %s1443_s22 = smov 0   ;;  %s1445_s23 = smov 0  }
   0xa LB: > { %s31_s24 = sadd.s32 1, %s1387_s22  ;;  %s67_s25 = sadd.s32 1, %s1379_s20  ;;  %s1391_s23 = sphi %s1445_s23, %s22_s23   ;;  %s1387_s22 = sphi %s1443_s22, %s1741_s22   ;;  %s1383_s21 = sphi %s1441_s21, %s1740_s21   ;;  %s1379_s20 = sphi %s1439_s20, %s1739_s20   ;;  %s1375_s19 = sphi %s1437_s19, %s1738_s19   ;;  %s1371_s18 = sphi %s1435_s18, %s1737_s18  }
   0xb   : > { %p32_p0 = scmp.ge.s32.totalorder %s31_s24, 2  ;;  %p74_p1 = scmp.ne.s32.totalorder %s1379_s20, %s1375_s19 }
   0xc   : > { %p75_p2 = scmp.eq.s32.totalorder %s1391_s23, 0  ;;  %p1097_p5 = scmp.lt.s32.totalorder %s1391_s23, 2 }
   0xd   : > { %s1743_s24 = smov (%p32_p0, %s31_s24), 0  ;;  %s223_s27 = sand.u32 1, %s1391_s23  }
   0xe   : > { %p76_p4 = por %p75_p2, %p74_p1  ;;  %s64_s26 = ssub.s32 %s1387_s22, %s1743_s24 }
   0xf   : > { %p65_p6 = scmp.eq.s32.totalorder %s64_s26, 0  ;;  %s225_s28 = sand.u32 1, %s1379_s20  }
  0x10   : > { %s1037_s29 = smul.u32 192, %s1387_s22  ;;  %s1723_s1 = sld [smem:[#allocation12_spill]] }
  0x11   : > { %s1483_s30 = scalar_select %p65_p6, %s1379_s20, %s67_s25  }
  0x12   : > { %s1066_s6 = smul.u32 384, %s225_s28  ;;  %p1490_p7 = pnand %p1097_p5, %p76_p4 }
  0x13   : > { %s1494_s13 = scalar_lea.sflag [#allocation6], %s223_s27  ;;  %s1393_s15 = smov [#allocation5]  }
  0x14   : > { %s227_s11 = scalar_lea.vmem [#allocation5], %s1066_s6  ;;  %p1719_p8 = pneg %p1490_p7 }
  0x15   : > { %s234_s12 = sshll.u32 %s227_s11, 4  ;;  %s1243_s16 = sshll.u32 %s1393_s15, 4  ;;  %s235_s12 = int_to_ptr.vmem [resolvable:$true] %s234_s12  ;;  %s1244_s16 = int_to_ptr.vmem [resolvable:$false] %s1243_s16 }
  0x16   : > { %s233_s9 = scalar_lea.hbm %s1723_s1, %s1037_s29  ;;  %s1238_s14 = scalar_lea.vmem %s235_s12, 6144 }
  0x17   : > { %p1239_p9 = scmp.ne.s32.totalorder %s235_s12, %s1238_s14  ;;  %s1245_s17 = scalar_lea.vmem %s1244_s16, 12288 }
  0x18   : > { %p1246_p12 = scmp.lt.s32.totalorder %s235_s12, %s1244_s16  ;;  %p1247_p13 = scmp.lt.s32.totalorder %s1245_s17, %s1238_s14 }
  0x19   : > { %p1241_p10 = pnand %p1239_p9, %p1719_p8 }
  0x1a   : > { %p1248_p0 = por %p1247_p13, %p1246_p12 }
  0x1b   : > { %p1242_p11 = pneg %p1241_p10 }
  0x1d   : > { %p1249_p2 = pnand %p1248_p0, %p1242_p11 }
  0x1f   : > { %1252 = shalt.err (!%p1249_p2)
}
  0x20   : > { %s1394_s25 = smov 384   ;;  %s1395_s26 = smov 192  }
  0x21   : > { %s1396_s27 = smov 12   ;;  %s1505_s29 = sadd.s32 4294967295, %s1391_s23  }
  0x22   : > { %1088 = dma.hbm_to_vmem [thread:$0]  (!%p1490_p7), %s233_s9, 6144, %s235_s12, %s1494_s13, %s1394_s25, %s1395_s26, %s1396_s27  }
  0x23   : > { %s974_s6 = sadd.s32 4294967294, %s1391_s23   ;;  %p80_p4 = scmp.ne.s32.totalorder %s1375_s19, %s1371_s18 }
  0x24   : > { %p1718_p5 = scmp.eq.s32.totalorder %s1505_s29, 0  ;;  %p174_p6 = scmp.eq.s32.totalorder %s1505_s29, 1 }
  0x25   : > { %p180_p9 = scmp.eq.s32.totalorder %s974_s6, 1  ;;  %p975_p11 = scmp.ge.s32.totalorder %s1391_s23, 1 }
  0x26   : > { %p1514_p10 = por %p1718_p5, %p80_p4  ;;  %p1522_p12 = por %p174_p6, %p74_p1 }
  0x27   : > { %p1526_p13 = por %p180_p9, %p80_p4  ;;  %p187_p0 = scmp.lt.s32.totalorder %s1391_s23, 3 }
  0x28   : > { %s1726_s8 = scalar_select %p1522_p12, 1, 0 }
  0x29   : > { %s1727_s9 = scalar_select %p1526_p13, 1, 0 }
  0x2a   : > { %p1531_p2 = pnand %p975_p11, %p187_p0  ;;  %s1397_s12 = smov [#allocation2]  }
  0x2b   : > { %s203_s14 = sshll.u32 %s1397_s12, 4  ;;  %s1067_s15 = smul.u32 3, %s225_s28  ;;  %s204_s14 = int_to_ptr.vmem [resolvable:$true] %s203_s14 }
  0x2c   : > { %p1081_p3 = pneg %p1531_p2  ;;  %s1038_s16 = smul.u32 48, %s1387_s22 }
  0x2d   : > { %s1730_s2 = sld [smem:[#allocation13_spill]]  ;;  %s248_s6 = scalar_lea.vmem [#allocation7], %s1067_s15 }
  0x2e   : > { %p1542_p1 = pnand %p1081_p3, %p1718_p5  ;;  %s256_s1 = sshll.u32 %s248_s6, 4  ;;  %s257_s1 = int_to_ptr.vmem [resolvable:$true] %s256_s1 }
  0x2f   : > { %s1264_s12 = scalar_lea.vmem %s204_s14, 512  ;;  %p1272_p0 = scmp.lt.s32.totalorder %s204_s14, %s204_s14 }
  0x30   : > { %p1255_p4 = pneg %p1542_p1  ;;  %p1265_p6 = scmp.ne.s32.totalorder %s204_s14, %s1264_s12 }
  0x31   : > { %p1273_p3 = scmp.lt.s32.totalorder %s1264_s12, %s1264_s12 }
  0x32   : > { %p1267_p9 = pnand %p1265_p6, %p1255_p4 }
  0x33   : > { %s1549_s27 = scalar_lea.hbm %s1730_s2, %s1038_s16  ;;  %p1274_p5 = por %p1273_p3, %p1272_p0 }
  0x34   : > { %p1268_p11 = pneg %p1267_p9 }
  0x36   : > { %p1275_p8 = pnand %p1274_p5, %p1268_p11 }
  0x38   : > { %1278 = shalt.err (!%p1275_p8)
}
  0x39   : > { %s1398_s28 = smov 256   ;;  %s1399_s25 = smov 16  }
  0x3a   : > { %1084 = dma.hbm_to_vmem [thread:$0]  (!%p1542_p1), %s1712_s0, 512, %s204_s14, [#allocation3], %s1398_s28, %s1398_s28, %s1399_s25  }
  0x3b   : > { %s1292_s26 = scalar_lea.vmem %s257_s1, 48  ;;  %p1731_p12 = pneg %p1490_p7 }
  0x3c   : > { %p1293_p13 = scmp.ne.s32.totalorder %s257_s1, %s1292_s26  ;;  %s1400_s6 = smov [#allocation7]  }
  0x3d   : > { %s1297_s12 = sshll.u32 %s1400_s6, 4  ;;  %s1298_s12 = int_to_ptr.vmem [resolvable:$false] %s1297_s12 }
  0x3e   : > { %p1295_p4 = pnand %p1293_p13, %p1731_p12  ;;  %s1299_s2 = scalar_lea.vmem %s1298_s12, 96 }
  0x3f   : > { %p1300_p8 = scmp.lt.s32.totalorder %s257_s1, %s1298_s12  ;;  %p1301_p5 = scmp.lt.s32.totalorder %s1299_s2, %s1292_s26 }
  0x40   : > { %p1296_p6 = pneg %p1295_p4 }
  0x41   : > { %p1302_p9 = por %p1301_p5, %p1300_p8 }
  0x43   : > { %p1303_p11 = pnand %p1302_p9, %p1296_p6 }
  0x45   : > { %1306 = shalt.err (!%p1303_p11)
}
  0x46   : > { %1091 = dma.hbm_to_vmem [thread:$0]  (!%p1490_p7), %s1549_s27, 48, %s257_s1, %s1494_s13  }
  0x47   : > { %265 = sbr.rel (%p1531_p2) target bundleno = 620 (0x26c), region = 40  ;;  %p1732_p12 = scmp.eq.s32.totalorder (!%p1531_p2), %s1505_s29, 0 }
  0x4c   : > { %1358 = dma.done.wait (%p1732_p12), [#allocation3], 512   ;;  %p1733_p13 = pmov %p1732_p12 }
  0x4d   : > { %s271_s2 = sand.u32 1, %s1505_s29   ;;  %s1573_s14 = sand.u32 1, %s1375_s19  }
  0x4e   : > { %1360 = vsyncadd (%p1733_p13), [#allocation3], 4294966784  ;;  %s1068_s10 = smul.u32 384, %s1573_s14  ;;  %s272_s17 = scalar_lea.sflag [#allocation6], %s271_s2 }
  0x50   : > { %s1576_s28 = scalar_lea.vmem [#allocation5], %s1068_s10 }
  0x51   : > { %1362 = dma.done.wait (%p1514_p10), %s272_s17, 6192  }
  0x52   : > { %1364 = vsyncadd (%p1514_p10), %s272_s17, 4294961104  ;;  %v322_v0 = vld [vmem:[#allocation2] sm:$0xff]  ;;  %v323_v1 = vld [vmem:[#allocation2 + $0x8] sm:$0xff]  ;;  %s1069_s11 = smul.u32 3, %s1573_s14  ;;  %p1734_p10 = scmp.ne.s32.totalorder %s1726_s8, 0 }
  0x53   : > { %v324_v2 = vld [vmem:[#allocation2 + $0x10] sm:$0xff]  ;;  %v326_v3 = vadd.f32 %v323_v1, %v322_v0  ;;  %v325_v4 = vld [vmem:[#allocation2 + $0x18] sm:$0xff]  ;;  %v1168_v14 = vld [vmem:[%s1576_s28 + $0x60] ss:$12 sps:$4 sm:$0xff]   ;;  %s1070_s25 = smul.u32 24, %s1573_s14  ;;  %s1401_s17 = smov [#allocation8]  }
  0x54   : > { %v329_v5 = vadd.f32 %v325_v4, %v324_v2  ;;  %v1157_v6 = vld [vmem:[%s1576_s28 + $0xac] ss:$12 sps:$4 sm:$0xff]   ;;  %v1159_v7 = vld [vmem:[%s1576_s28 + $0xa8] ss:$12 sps:$4 sm:$0xff]   ;;  %v1162_v9 = vld [vmem:[%s1576_s28 + $0x90] ss:$12 sps:$4 sm:$0xff]  }
  0x55   : > { %327 = vadd.xlane.f32.xlu0 %v326_v3  ;;  %v1160_v8 = vld [vmem:[%s1576_s28 + $0x94] ss:$12 sps:$4 sm:$0xff]   ;;  %730 = vmatprep.subr.bf16.mxu0 %v1157_v6  ;;  %v1163_v10 = vld [vmem:[%s1576_s28 + $0x7c] ss:$12 sps:$4 sm:$0xff]   ;;  %v1165_v12 = vld [vmem:[%s1576_s28 + $0x78] ss:$12 sps:$4 sm:$0xff]  }
  0x56   : > { %731 = vmatpush1.bf16.msra.mxu0 %v1159_v7  ;;  %v1183_v11 = vld [vmem:[%s1576_s28 + $0x170] ss:$12 sps:$4 sm:$0xff]   ;;  %v1169_v15 = vld [vmem:[%s1576_s28 + $0x4c] ss:$12 sps:$4 sm:$0xff]   ;;  %v1171_v16 = vld [vmem:[%s1576_s28 + $0x48] ss:$12 sps:$4 sm:$0xff]  }
  0x57   : > { %732 = vmatprep.subr.bf16.mxu0 %v1160_v8  ;;  %1044 = vmatprep.subr.bf16.mxu1 %v1183_v11  ;;  %v1166_v13 = vld [vmem:[%s1576_s28 + $0x64] ss:$12 sps:$4 sm:$0xff]   ;;  %v1172_v17 = vld [vmem:[%s1576_s28 + $0x34] ss:$12 sps:$4 sm:$0xff]   ;;  %v1175_v19 = vld [vmem:[%s1576_s28 + $0x1c] ss:$12 sps:$4 sm:$0xff]  }
  0x58   : > { %v1174_v18 = vld [vmem:[%s1576_s28 + $0x30] ss:$12 sps:$4 sm:$0xff]   ;;  %v1177_v20 = vld [vmem:[%s1576_s28 + $0x18] ss:$12 sps:$4 sm:$0xff]   ;;  %v1180_v22 = vld [vmem:[%s1576_s28] ss:$12 sps:$4 sm:$0xff]  }
  0x59   : > { %330 = vadd.xlane.f32.xlu0 %v329_v5  ;;  %v1178_v21 = vld [vmem:[%s1576_s28 + $0x4] ss:$12 sps:$4 sm:$0xff]   ;;  %v1181_v23 = vld [vmem:[%s1576_s28 + $0x16c] ss:$12 sps:$4 sm:$0xff]   ;;  %v1184_v38 = vld [vmem:[%s1576_s28 + $0x168] ss:$12 sps:$4 sm:$0xff]  }
  0x5a   : > { %733 = vmatpush1.bf16.msra.mxu0 %v1162_v9  ;;  %v1185_v39 = vld [vmem:[%s1576_s28 + $0xb0] ss:$12 sps:$4 sm:$0xff]   ;;  %v1186_v40 = vld [vmem:[%s1576_s28 + $0x154] ss:$12 sps:$4 sm:$0xff]   ;;  %v1188_v41 = vld [vmem:[%s1576_s28 + $0x158] ss:$12 sps:$4 sm:$0xff]  }
  0x5b   : > { %734 = vmatprep.subr.bf16.mxu0 %v1163_v10  ;;  %1045 = vmatpush3.bf16.msra.mxu1 %v1185_v39  ;;  %v1189_v42 = vld [vmem:[%s1576_s28 + $0x150] ss:$12 sps:$4 sm:$0xff]   ;;  %v1190_v43 = vld [vmem:[%s1576_s28 + $0x98] ss:$12 sps:$4 sm:$0xff]   ;;  %v1193_v45 = vld [vmem:[%s1576_s28 + $0x140] ss:$12 sps:$4 sm:$0xff]   ;;  %v361_v10 = vlaneseq }
  0x5c   : > { %1046 = vmatprep.subr.bf16.mxu1 %v1188_v41  ;;  %v1191_v44 = vld [vmem:[%s1576_s28 + $0x13c] ss:$12 sps:$4 sm:$0xff]   ;;  %v1194_v46 = vld [vmem:[%s1576_s28 + $0x138] ss:$12 sps:$4 sm:$0xff]   ;;  %v1195_v47 = vld [vmem:[%s1576_s28 + $0x80] ss:$12 sps:$4 sm:$0xff]  }
  0x5d   : > { %v1196_v48 = vld [vmem:[%s1576_s28 + $0x124] ss:$12 sps:$4 sm:$0xff]   ;;  %v1198_v49 = vld [vmem:[%s1576_s28 + $0x128] ss:$12 sps:$4 sm:$0xff]   ;;  %v1199_v50 = vld [vmem:[%s1576_s28 + $0x120] ss:$12 sps:$4 sm:$0xff]  }
  0x5e   : > { %735 = vmatpush1.bf16.msra.mxu0 %v1165_v12  ;;  %v1200_v51 = vld [vmem:[%s1576_s28 + $0x68] ss:$12 sps:$4 sm:$0xff]   ;;  %v1201_v52 = vld [vmem:[%s1576_s28 + $0x10c] ss:$12 sps:$4 sm:$0xff]   ;;  %v1203_v53 = vld [vmem:[%s1576_s28 + $0x110] ss:$12 sps:$4 sm:$0xff]  }
  0x5f   : > { %736 = vmatprep.subr.bf16.mxu0 %v1166_v13  ;;  %1047 = vmatpush3.bf16.msra.mxu1 %v1190_v43  ;;  %v1204_v54 = vld [vmem:[%s1576_s28 + $0x108] ss:$12 sps:$4 sm:$0xff]   ;;  %v1205_v55 = vld [vmem:[%s1576_s28 + $0x50] ss:$12 sps:$4 sm:$0xff]   ;;  %v1208_v57 = vld [vmem:[%s1576_s28 + $0xf8] ss:$12 sps:$4 sm:$0xff]  }
  0x60   : > { %1048 = vmatprep.subr.bf16.mxu1 %v1193_v45  ;;  %v1206_v56 = vld [vmem:[%s1576_s28 + $0xf4] ss:$12 sps:$4 sm:$0xff]   ;;  %v1209_v58 = vld [vmem:[%s1576_s28 + $0xf0] ss:$12 sps:$4 sm:$0xff]   ;;  %v1210_v59 = vld [vmem:[%s1576_s28 + $0x38] ss:$12 sps:$4 sm:$0xff]  }
  0x61   : > { %v1211_v60 = vld [vmem:[%s1576_s28 + $0xdc] ss:$12 sps:$4 sm:$0xff]   ;;  %v1213_v61 = vld [vmem:[%s1576_s28 + $0xe0] ss:$12 sps:$4 sm:$0xff]   ;;  %v1214_v62 = vld [vmem:[%s1576_s28 + $0xd8] ss:$12 sps:$4 sm:$0xff]  }
  0x62   : > { %737 = vmatpush1.bf16.msra.mxu0 %v1168_v14  ;;  %v1215_v63 = vld [vmem:[%s1576_s28 + $0x20] ss:$12 sps:$4 sm:$0xff]   ;;  %v1220_v3 = vld [vmem:[%s1576_s28 + $0x8] ss:$12 sps:$4 sm:$0xff]   ;;  %v362_v11 = vshrl.u32 %v361_v10, 7  ;;  %s284_s27 = scalar_lea.vmem [#allocation7], %s1069_s11 }
  0x63   : > { %738 = vmatprep.subr.bf16.mxu0 %v1169_v15  ;;  %1049 = vmatpush3.bf16.msra.mxu1 %v1195_v47  ;;  %v359_v14 = vld [vmem:[%s1715_s3] sm:$0x3]  ;;  %s315_s16 = scalar_lea.vmem [#allocation8], %s1070_s25  ;;  %s1043_s26 = smul.u32 192, %s1383_s21 }
  0x64   : > { %1050 = vmatprep.subr.bf16.mxu1 %v1198_v49  ;;  %v363_v12 = vsub.s32 0, %v362_v11  ;;  %v367_v13 = vsub.s32 1, %v362_v11  ;;  %s855_s15 = sshll.u32 %s315_s16, 4  ;;  %s839_s21 = scalar_lea.sflag [#allocation4], %s1573_s14  ;;  %s1659_s15 = int_to_ptr.vmem [resolvable:$true] %s855_s15 }
  0x65   : > { %s1664_s2 = scalar_lea.hbm %s1717_s5, %s1043_s26  ;;  %s1307_s10 = scalar_lea.vmem %s1659_s15, 384 }
  0x66   : > { %739 = vmatpush1.bf16.msra.mxu0 %v1171_v16  ;;  %p1308_p7 = scmp.ne.s32.totalorder %s1659_s15, %s1307_s10 }
  0x67   : > { %740 = vmatprep.subr.bf16.mxu0 %v1172_v17  ;;  %1051 = vmatpush3.bf16.msra.mxu1 %v1200_v51  ;;  %v364_v17 = vrot.slane %v359_v14, %v363_v12 }
  0x68   : > { %1052 = vmatprep.subr.bf16.mxu1 %v1203_v53  ;;  %p1309_p2 = pnand %p1308_p7, %p1734_p10 }
  0x6a   : > { %741 = vmatpush1.bf16.msra.mxu0 %v1174_v18  ;;  %v368_v18 = vrot.slane %v359_v14, %v367_v13  ;;  %p1310_p1 = pneg %p1309_p2 }
  0x6b   : > { %742 = vmatprep.subr.bf16.mxu0 %v1175_v19  ;;  %1053 = vmatpush3.bf16.msra.mxu1 %v1205_v55  ;;  %v375_v19 = vld [vmem:[%s1716_s4] sm:$0x3] }
  0x6c   : > { %1054 = vmatprep.subr.bf16.mxu1 %v1208_v57 }
  0x6e   : > { %743 = vmatpush1.bf16.msra.mxu0 %v1177_v20 }
  0x6f   : > { %744 = vmatprep.subr.bf16.mxu0 %v1178_v21  ;;  %1055 = vmatpush3.bf16.msra.mxu1 %v1210_v59 }
  0x70   : > { %1056 = vmatprep.subr.bf16.mxu1 %v1213_v61 }
  0x72   : > { %745 = vmatpush1.bf16.msra.mxu0 %v1180_v22  ;;  %v380_v22 = vrot.slane %v375_v19, %v363_v12 }
  0x73   : > { %746 = vmatprep.subr.bf16.mxu0 %v1181_v23  ;;  %1057 = vmatpush3.bf16.msra.mxu1 %v1215_v63  ;;  %v384_v23 = vrot.slane %v375_v19, %v367_v13 }
  0x76   : > { %747 = vmatpush2.bf16.msra.mxu0 %v1184_v38 }
  0x77   : > { %748 = vmatprep.subr.bf16.mxu0 %v1186_v40 }
  0x7a   : > { %749 = vmatpush2.bf16.msra.mxu0 %v1189_v42 }
  0x7b   : > { %750 = vmatprep.subr.bf16.mxu0 %v1191_v44 }
  0x7e   : > { %751 = vmatpush2.bf16.msra.mxu0 %v1194_v46 }
  0x7f   : > { %752 = vmatprep.subr.bf16.mxu0 %v1196_v48 }
  0x82   : > { %753 = vmatpush2.bf16.msra.mxu0 %v1199_v50 }
  0x83   : > { %754 = vmatprep.subr.bf16.mxu0 %v1201_v52 }
  0x86   : > { %755 = vmatpush2.bf16.msra.mxu0 %v1204_v54 }
  0x87   : > { %756 = vmatprep.subr.bf16.mxu0 %v1206_v56 }
  0x8a   : > { %757 = vmatpush2.bf16.msra.mxu0 %v1209_v58 }
  0x8b   : > { %758 = vmatprep.subr.bf16.mxu0 %v1211_v60 }
  0x8e   : > { %759 = vmatpush2.bf16.msra.mxu0 %v1214_v62 }
  0xde   : > { %v328_v24 = vpop.xlane.xlu0 %327 }
  0xdf   : > { %v333_v25 = vmul.f32 0.00390625, %v328_v24 }
  0xe1   : > { %v1600_v26 = vsub.f32 %v322_v0, %v333_v25  ;;  %v1602_v27 = vsub.f32 %v323_v1, %v333_v25  ;;  %v1216_v0 = vld [vmem:[%s1576_s28 + $0xc4] ss:$12 sps:$4 sm:$0xff]   ;;  %v1218_v1 = vld [vmem:[%s1576_s28 + $0xc8] ss:$12 sps:$4 sm:$0xff]  }
  0xe2   : > { %v331_v28 = vpop.xlane.xlu0 %330  ;;  %760 = vmatprep.subr.bf16.mxu0 %v1216_v0  ;;  %1058 = vmatprep.subr.bf16.mxu1 %v1218_v1 }
  0xe3   : > { %v334_v29 = vmul.f32 0.00390625, %v331_v28  ;;  %v339_v30 = vmul.f32 %v1600_v26, %v1600_v26  ;;  %v340_v31 = vmul.f32 %v1602_v27, %v1602_v27  ;;  %1059 = vmatpush3.bf16.msra.mxu1 %v1220_v3 }
  0xe5   : > { %v1608_v32 = vsub.f32 %v324_v2, %v334_v29  ;;  %v1610_v33 = vsub.f32 %v325_v4, %v334_v29  ;;  %v343_v34 = vadd.f32 %v340_v31, %v339_v30  ;;  %v1219_v2 = vld [vmem:[%s1576_s28 + $0xc0] ss:$12 sps:$4 sm:$0xff]   ;;  %s1311_s28 = sshll.u32 %s1401_s17, 4  ;;  %s1312_s28 = int_to_ptr.vmem [resolvable:$false] %s1311_s28 }
  0xe6   : > { %761 = vmatpush2.bf16.msra.mxu0 %v1219_v2  ;;  %s1313_s1 = scalar_lea.vmem %s1312_s28, 768  ;;  %p1314_p0 = scmp.lt.s32.totalorder %s1659_s15, %s1312_s28 }
  0xe7   : > { %344 = vadd.xlane.f32.xlu1 %v343_v34  ;;  %v341_v35 = vmul.f32 %v1608_v32, %v1608_v32  ;;  %v342_v36 = vmul.f32 %v1610_v33, %v1610_v33  ;;  %p1315_p3 = scmp.lt.s32.totalorder %s1313_s1, %s1307_s10 }
  0xe9   : > { %v346_v37 = vadd.f32 %v342_v36, %v341_v35  ;;  %p1316_p4 = por %p1315_p3, %p1314_p0 }
  0xeb   : > { %347 = vadd.xlane.f32.xlu1 %v346_v37  ;;  %p1317_p6 = pnand %p1316_p4, %p1310_p1 }
 0x170   : > { %v345_v4 = vpop.xlane.xlu1 %344 }
 0x171   : > { %v349_v5 = vmul.f32 0.00390625, %v345_v4 }
 0x173   : > { %v351_v6 = vadd.f32 1e-05, %v349_v5 }
 0x174   : > { %v348_v7 = vpop.xlane.xlu1 %347 }
 0x175   : > { %1221 = vrsqrt.f32 %v351_v6  ;;  %v350_v8 = vmul.f32 0.00390625, %v348_v7 }
 0x177   : > { %v352_v9 = vadd.f32 1e-05, %v350_v8 }
 0x179   : > { %1223 = vrsqrt.f32 %v352_v9 }
 0x182   : > { %v1222_v15 = vpop.eup %1221 }
 0x183   : > { %v356_v16 = vmul.f32 %v1222_v15, %v1602_v27  ;;  %v355_v20 = vmul.f32 %v1222_v15, %v1600_v26  ;;  %v457_v26 = vld [vmem:[%s284_s27] sm:$0x7] }
 0x184   : > { %v462_v39 = vrot.slane %v457_v26, %v363_v12 }
 0x185   : > { %v372_v25 = vmul.f32 %v368_v18, %v356_v16  ;;  %v371_v29 = vmul.f32 %v364_v17, %v355_v20 }
 0x186   : > { %v1224_v21 = vpop.eup %1223 }
 0x187   : > { %v358_v24 = vmul.f32 %v1224_v21, %v1610_v33  ;;  %v357_v28 = vmul.f32 %v1224_v21, %v1608_v32  ;;  %v388_v31 = vadd.f32 %v384_v23, %v372_v25  ;;  %v387_v35 = vadd.f32 %v380_v22, %v371_v29 }
 0x188   : > { %v469_v33 = vsub.s32 2, %v362_v11  ;;  %v466_v32 = vrot.slane %v457_v26, %v367_v13 }
 0x189   : > { %v374_v30 = vmul.f32 %v368_v18, %v358_v24  ;;  %v373_v27 = vmul.f32 %v364_v17, %v357_v28 }
 0x18a   : > { %v470_v42 = vrot.slane %v457_v26, %v469_v33 }
 0x18b   : > { %v390_v34 = vadd.f32 %v384_v23, %v374_v30  ;;  %v389_v36 = vadd.f32 %v380_v22, %v373_v27 }
 0x18d   : > { %v392_v37 = vpack.c.bf16 %v390_v34, %v388_v31  ;;  %v391_v38 = vpack.c.bf16 %v389_v36, %v387_v35 }
 0x18f   : > { %762 = vmatprep.mubr.bf16.mxu0 %v392_v37  ;;  %805 = vmatprep.mubr.bf16.mxu1 %v392_v37 }
 0x190   : > { %763 = vmatmul.mubr.bf16.vlgmr.msra.gmra.mxu0 %v391_v38  ;;  %806 = vmatmul.mubr.bf16.vlgmr.msra.gmra.mxu1 %v391_v38 }
 0x250   : > { %v764_v40 = vpop.f32.mrf.mxu0  ;;  %v1060_v41 = vpop.f32.mrf.mxu1 }
 0x251   : > { %v765_v45 = vadd.f32 %v764_v40, %v462_v39 }
 0x252   : > { %v766_v43 = vpop.f32.mrf.mxu0  ;;  %v1061_v44 = vpop.f32.mrf.mxu1 }
 0x253   : > { %v767_v46 = vadd.f32 %v766_v43, %v466_v32  ;;  %v1062_v47 = vadd.f32 %v1061_v44, %v1060_v41 }
 0x254   : > { %v768_v48 = vpop.f32.mrf.mxu0  ;;  %v1063_v49 = vpop.f32.mrf.mxu1 }
 0x255   : > { %v1039_v50 = vpack.c.bf16 %v767_v46, %v765_v45  ;;  %v808_v51 = vadd.f32 %v1062_v47, %v470_v42  ;;  %v769_v55 = vadd.f32 %v768_v48, %v462_v39 }
 0x256   : > { %v770_v52 = vpop.f32.mrf.mxu0  ;;  %v1064_v53 = vpop.f32.mrf.mxu1 }
 0x257   : > { %834 = vst [vmem:[%s315_s16] sm:$0xff] %v1039_v50  ;;  %v1040_v54 = vpack.c.bf16 %v808_v51, %v808_v51  ;;  %v771_v56 = vadd.f32 %v770_v52, %v466_v32  ;;  %v1065_v57 = vadd.f32 %v1064_v53, %v1063_v49 }
 0x259   : > { %835 = vst [vmem:[%s315_s16 + $0x8] sm:$0xf] %v1040_v54  ;;  %v1041_v58 = vpack.c.bf16 %v771_v56, %v769_v55  ;;  %v811_v59 = vadd.f32 %v1065_v57, %v470_v42 }
 0x25b   : > { %836 = vst [vmem:[%s315_s16 + $0xc] sm:$0xff] %v1041_v58  ;;  %v1042_v60 = vpack.c.bf16 %v811_v59, %v811_v59 }
 0x25d   : > { %837 = vst [vmem:[%s315_s16 + $0x14] sm:$0xf] %v1042_v60 }
 0x25e   : > { %1320 = shalt.err (!%p1317_p6)
}
 0x25f   : > { %s1321_s13 = scalar_lea.hbm %s1664_s2, 384  ;;  %s1325_s11 = scalar_lea.hbm %s1717_s5, 768 }
 0x260   : > { %p1322_p8 = scmp.ne.s32.totalorder %s1664_s2, %s1321_s13  ;;  %p1326_p11 = scmp.lt.s32.totalorder %s1664_s2, %s1717_s5 }
 0x261   : > { %p1327_p12 = scmp.lt.s32.totalorder %s1325_s11, %s1321_s13 }
 0x262   : > { %p1323_p5 = pnand %p1322_p8, %p1734_p10 }
 0x263   : > { %p1328_p13 = por %p1327_p12, %p1326_p11 }
 0x264   : > { %p1324_p9 = pneg %p1323_p5 }
 0x266   : > { %p1329_p7 = pnand %p1328_p13, %p1324_p9 }
 0x268   : > { %1332 = shalt.err (!%p1329_p7)
}
 0x269   : > { %s1402_s16 = smov 192   ;;  %s1403_s26 = smov 384  }
 0x26a   : > { %s1404_s6 = smov 12  }
 0x26b   : > { %1079 = dma.vmem_to_hbm [thread:$0]  (%p1734_p10), %s1659_s15, 384, %s1664_s2, %s839_s21, %s1402_s16, %s1403_s26, %s1404_s6  }
 0x26c PF: > { %s870_s12 = sand.u32 1, %s1371_s18   ;;  %p1735_p2 = scmp.ne.s32.totalorder %s1727_s9, 0 }
 0x26d   : > { %p1736_p1 = scmp.ge.s32.totalorder %s1391_s23, 2  ;;  %s871_s10 = scalar_lea.sflag [#allocation4], %s870_s12 }
 0x26f   : > { %p1093_p0 = pnand %p1736_p1, %p1735_p2 }
 0x271   : > { %p1094_p3 = pneg %p1093_p0 }
 0x273   : > { %1366 = dma.done.wait (%p1094_p3), %s871_s10, 384  }
 0x274   : > { %1368 = vsyncadd (%p1094_p3), %s871_s10, 4294966912  ;;  %s22_s23 = sadd.s32 1, %s1391_s23   ;;  %s1737_s18 = smov %s1375_s19 }
 0x275   : > { %p19_p4 = scmp.ge.s32.totalorder %s22_s23, 4   ;;  %s1738_s19 = smov %s1379_s20 }
 0x276   : > { %s1739_s20 = smov %s1483_s30  ;;  %s1740_s21 = smov %s1387_s22 }
 0x277   : > { %s1741_s22 = smov %s1743_s24  ;;  %21 = sbr.rel (!%p19_p4) target bundleno = 10 (0xa), region = 102 }
 0x27c   :  { %876 = vsyncpa [#allocation3], 1 }
 0x27d   :  { %878 = vsyncpa [#allocation3 + $0x1], 1 }
 0x27e   :  { %879 = vsyncpa [#allocation6], 1 }
 0x27f   :  { %881 = vsyncpa [#allocation6 + $0x1], 1 }
 0x280   :  { %882 = vsyncpa [#allocation4], 1 }
 0x281   :  { %884 = vsyncpa [#allocation4 + $0x1], 1 }

</bundles_post_ra>
